<compile_context>
chip_gen: v5e
topology: v5e:2x2
jax: 0.10.0
libtpu: 0.0.40
codegen_flags: <defaults>
</compile_context>

<pallas_src>
import jax
import jax.numpy as jnp
from jax import lax
from jax.experimental import pallas as pl
from jax.experimental.pallas import tpu as pltpu

INF = 10000000000.0  # matches `inf` in the PyTorch module


def _coattention_kernel(len1_ref, len2_ref, x1_ref, x2_ref, out_ref, acc_ref):
    b = pl.program_id(0)
    i = pl.program_id(1)
    j = pl.program_id(2)
    k = pl.program_id(3)
    nk = pl.num_programs(3)

    # MXU contraction over this D-chunk; contract x2's hidden dim via
    # dimension_numbers instead of materializing x2.T.
    partial = lax.dot_general(
        x1_ref[0],                      # (TM, TK)
        x2_ref[0],                      # (TN, TK)
        dimension_numbers=(((1,), (1,)), ((), ())),
        preferred_element_type=jnp.float32,
    )                                    # (TM, TN) f32

    @pl.when(k == 0)
    def _():
        acc_ref[...] = partial

    @pl.when(k > 0)
    def _():
        acc_ref[...] += partial

    @pl.when(k == nk - 1)
    def _():
        tm = out_ref.shape[1]
        tn = out_ref.shape[2]
        l1 = len1_ref[b]                 # scalars from SMEM
        l2 = len2_ref[b]
        row0 = i * tm
        col0 = j * tn
        scores = acc_ref[...]

        fully_valid = jnp.logical_and(row0 + tm <= l1, col0 + tn <= l2)

        @pl.when(fully_valid)
        def _():
            # Fast path: tile entirely inside the valid region -> no mask work.
            out_ref[0] = scores.astype(out_ref.dtype)

        @pl.when(jnp.logical_not(fully_valid))
        def _():
            # Two tiny iotas + one select (robust even if padding holds
            # NaN/inf, unlike scores*mask - (1-mask)*INF).
            row_ok = (row0 + lax.broadcasted_iota(jnp.int32, (tm, 1), 0)) < l1
            col_ok = (col0 + lax.broadcasted_iota(jnp.int32, (1, tn), 1)) < l2
            valid = jnp.logical_and(row_ok, col_ok)
            out_ref[0] = jnp.where(valid, scores, -INF).astype(out_ref.dtype)


def _pick_tile(dim, candidates):
    """Largest candidate tile that evenly divides `dim`; else the full dim."""
    for c in candidates:
        if dim >= c and dim % c == 0:
            return c
    return dim


def coattention_forward(x1, x2, xlen1, xlen2):
    """x1: (B, L1, D), x2: (B, L2, D), xlen1/xlen2: (B,) or (B,1) ints.

    Returns (B, L1, L2) f32 masked co-attention scores matching the PyTorch
    coattention.forward (which implicitly requires L1 == max(xlen1),
    L2 == max(xlen2)).
    """
    B, L1, D = x1.shape
    _, L2, _ = x2.shape

    xlen1 = xlen1.astype(jnp.int32).reshape(B)
    xlen2 = xlen2.astype(jnp.int32).reshape(B)

    # Tile sizes: lane-dense (multiples of 128) when possible, capped so the
    # double-buffered working set fits every generation's scoped VMEM.
    tm = _pick_tile(L1, (512, 256, 128))
    tn = _pick_tile(L2, (512, 256, 128))
    tk = _pick_tile(D, (512, 256, 128))

    grid = (B, L1 // tm, L2 // tn, D // tk)

    itemsize = jnp.dtype(x1.dtype).itemsize
    vmem_est = (
        2 * (tm * tk + tn * tk) * itemsize  # double-buffered input tiles
        + 2 * tm * tn * 4                   # double-buffered output tiles (f32)
        + tm * tn * 4                       # accumulator scratch
    )
    vmem_limit = int(min(max(vmem_est + (4 << 20), 16 << 20), 48 << 20))

    grid_spec = pltpu.PrefetchScalarGridSpec(
        num_scalar_prefetch=2,
        grid=grid,
        in_specs=[
            pl.BlockSpec((1, tm, tk), lambda b, i, j, k, l1, l2: (b, i, k)),
            pl.BlockSpec((1, tn, tk), lambda b, i, j, k, l1, l2: (b, j, k)),
        ],
        out_specs=pl.BlockSpec((1, tm, tn), lambda b, i, j, k, l1, l2: (b, i, j)),
        scratch_shapes=[pltpu.VMEM((tm, tn), jnp.float32)],
    )

    return pl.pallas_call(
        _coattention_kernel,
        out_shape=jax.ShapeDtypeStruct((B, L1, L2), jnp.float32),
        grid_spec=grid_spec,
        compiler_params=pltpu.CompilerParams(
            dimension_semantics=("parallel", "parallel", "parallel", "arbitrary"),
            vmem_limit_bytes=vmem_limit,
        ),
    )(xlen1, xlen2, x1, x2)


def _reference(x1, x2, xlen1, xlen2):
    # Pure-JAX reference mirroring the PyTorch module (masked_fill-style).
    B, L1, _ = x1.shape
    L2 = x2.shape[1]
    scores = jnp.einsum("bld,bmd->blm", x1, x2, precision=lax.Precision.HIGHEST)
    row = jnp.arange(L1)[None, :, None]
    col = jnp.arange(L2)[None, None, :]
    mask = (row < xlen1[:, None, None]) & (col < xlen2[:, None, None])
    return jnp.where(mask, scores, -INF).astype(jnp.float32)


if __name__ == "__main__":
    key = jax.random.PRNGKey(0)
    k1, k2, k3, k4 = jax.random.split(key, 4)

    # Integer-valued f32 inputs: exactly representable in bf16, so the MXU
    # result is exact and comparisons against the f32 reference are tight.

    # --- Small test (single-tile path, matches the module's toy shapes) ---
    B, L1, L2, D = 2, 8, 8, 32
    x1 = jax.random.randint(k1, (B, L1, D), -4, 5).astype(jnp.float32)
    x2 = jax.random.randint(k2, (B, L2, D), -4, 5).astype(jnp.float32)
    xlen1 = jnp.array([8, 5], dtype=jnp.int32)
    xlen2 = jnp.array([8, 6], dtype=jnp.int32)

    out = coattention_forward(x1, x2, xlen1, xlen2)
    out = jax.block_until_ready(out)
    ref = _reference(x1, x2, xlen1, xlen2)
    assert out.shape == (B, L1, L2)
    assert jnp.allclose(out, ref, atol=1e-4, rtol=1e-4)

    # --- Larger test exercising the tiled grid, K-accumulation and both the
    #     fast (fully-valid) and masked tile paths ---
    B2, L1b, L2b, Db = 2, 384, 384, 1024
    y1 = jax.random.randint(k3, (B2, L1b, Db), -3, 4).astype(jnp.float32)
    y2 = jax.random.randint(k4, (B2, L2b, Db), -3, 4).astype(jnp.float32)
    ylen1 = jnp.array([384, 130], dtype=jnp.int32)
    ylen2 = jnp.array([384, 200], dtype=jnp.int32)

    out2 = coattention_forward(y1, y2, ylen1, ylen2)
    out2 = jax.block_until_ready(out2)
    ref2 = _reference(y1, y2, ylen1, ylen2)
    assert out2.shape == (B2, L1b, L2b)
    assert jnp.allclose(out2, ref2, atol=1e-3, rtol=1e-3)

    print("KERNEL_OK")
</pallas_src>

<mosaic_0001>
module attributes {stable_mosaic.version = 11 : i64} {
  func.func @_coattention_kernel(%arg0: i32, %arg1: i32, %arg2: i32, %arg3: i32, %arg4: memref<2xi32, #tpu.memory_space<smem>>, %arg5: memref<2xi32, #tpu.memory_space<smem>>, %arg6: memref<1x8x32xf32, #tpu.memory_space<vmem>>, %arg7: memref<1x8x32xf32, #tpu.memory_space<vmem>>, %arg8: memref<1x8x8xf32, #tpu.memory_space<vmem>>, %arg9: memref<8x8xf32, #tpu.memory_space<vmem>>) attributes {dimension_semantics = [#tpu.dimension_semantics<parallel>, #tpu.dimension_semantics<parallel>, #tpu.dimension_semantics<parallel>, #tpu.dimension_semantics<arbitrary>], iteration_bounds = array<i64: 2, 1, 1, 1>, scalar_prefetch = 2 : i64, scratch_operands = 1 : i64, tpu.core_type = #tpu.core_type<tc>, window_params = [{transform_indices = @transform_0, window_bounds = array<i64: 1, 8, 32>}, {transform_indices = @transform_1, window_bounds = array<i64: 1, 8, 32>}, {transform_indices = @transform_2, window_bounds = array<i64: 1, 8, 8>}]} {
    %c0 = arith.constant 0 : index
    %c0_0 = arith.constant 0 : index
    %c0_1 = arith.constant 0 : index
    %0 = vector.load %arg6[%c0, %c0_0, %c0_1] : memref<1x8x32xf32, #tpu.memory_space<vmem>>, vector<1x8x32xf32>
    %1 = vector.shape_cast %0 : vector<1x8x32xf32> to vector<8x32xf32>
    %c0_2 = arith.constant 0 : index
    %c0_3 = arith.constant 0 : index
    %c0_4 = arith.constant 0 : index
    %2 = vector.load %arg7[%c0_2, %c0_3, %c0_4] : memref<1x8x32xf32, #tpu.memory_space<vmem>>, vector<1x8x32xf32>
    %3 = vector.shape_cast %2 : vector<1x8x32xf32> to vector<8x32xf32>
    %cst = arith.constant dense<0.000000e+00> : vector<8x8xf32>
    %4 = tpu.matmul %1, %3, %cst {dimension_numbers = #tpu.dot_dimension_numbers<[1], [1], [0], [0], [0, 0, 1, 0], [], []>} : vector<8x32xf32>, vector<8x32xf32>, vector<8x8xf32> -> vector<8x8xf32>
    %c0_i32 = arith.constant 0 : i32
    %5 = arith.cmpi eq, %arg3, %c0_i32 : i32
    %6 = arith.extui %5 : i1 to i32
    %c0_i32_5 = arith.constant 0 : i32
    %7 = arith.cmpi ne, %6, %c0_i32_5 : i32
    scf.if %7 {
      %c0_10 = arith.constant 0 : index
      %c0_11 = arith.constant 0 : index
      %14 = vector.load %arg9[%c0_10, %c0_11] : memref<8x8xf32, #tpu.memory_space<vmem>>, vector<8x8xf32>
      tpu.vector_store %arg9[%c0_10, %c0_11], %4 {strides = array<i32>} : memref<8x8xf32, #tpu.memory_space<vmem>>, vector<8x8xf32>,
    } else {
    }
    %c0_i32_6 = arith.constant 0 : i32
    %8 = arith.cmpi sgt, %arg3, %c0_i32_6 : i32
    %9 = arith.extui %8 : i1 to i32
    %c0_i32_7 = arith.constant 0 : i32
    %10 = arith.cmpi ne, %9, %c0_i32_7 : i32
    scf.if %10 {
      %c0_10 = arith.constant 0 : index
      %c0_11 = arith.constant 0 : index
      %14 = vector.load %arg9[%c0_10, %c0_11] : memref<8x8xf32, #tpu.memory_space<vmem>>, vector<8x8xf32>
      %15 = arith.addf %14, %4 : vector<8x8xf32>
      %c0_12 = arith.constant 0 : index
      %c0_13 = arith.constant 0 : index
      %16 = vector.load %arg9[%c0_12, %c0_13] : memref<8x8xf32, #tpu.memory_space<vmem>>, vector<8x8xf32>
      tpu.vector_store %arg9[%c0_12, %c0_13], %15 {strides = array<i32>} : memref<8x8xf32, #tpu.memory_space<vmem>>, vector<8x8xf32>,
    } else {
    }
    %c0_i32_8 = arith.constant 0 : i32
    %11 = arith.cmpi eq, %arg3, %c0_i32_8 : i32
    %12 = arith.extui %11 : i1 to i32
    %c0_i32_9 = arith.constant 0 : i32
    %13 = arith.cmpi ne, %12, %c0_i32_9 : i32
    scf.if %13 {
      %14 = arith.index_cast %arg0 : i32 to index
      %15 = memref.load %arg4[%14] : memref<2xi32, #tpu.memory_space<smem>>
      %16 = arith.index_cast %arg0 : i32 to index
      %17 = memref.load %arg5[%16] : memref<2xi32, #tpu.memory_space<smem>>
      %c8_i32 = arith.constant 8 : i32
      %18 = arith.muli %arg1, %c8_i32 : i32
      %c8_i32_10 = arith.constant 8 : i32
      %19 = arith.muli %arg2, %c8_i32_10 : i32
      %c0_11 = arith.constant 0 : index
      %c0_12 = arith.constant 0 : index
      %20 = vector.load %arg9[%c0_11, %c0_12] : memref<8x8xf32, #tpu.memory_space<vmem>>, vector<8x8xf32>
      %c8_i32_13 = arith.constant 8 : i32
      %21 = arith.addi %18, %c8_i32_13 : i32
      %22 = arith.cmpi sle, %21, %15 : i32
      %c8_i32_14 = arith.constant 8 : i32
      %23 = arith.addi %19, %c8_i32_14 : i32
      %24 = arith.cmpi sle, %23, %17 : i32
      %25 = arith.andi %22, %24 : i1
      %26 = arith.extui %25 : i1 to i32
      %c0_i32_15 = arith.constant 0 : i32
      %27 = arith.cmpi ne, %26, %c0_i32_15 : i32
      scf.if %27 {
        %c0_17 = arith.constant 0 : index
        %c0_18 = arith.constant 0 : index
        %c0_19 = arith.constant 0 : index
        %31 = vector.load %arg8[%c0_17, %c0_18, %c0_19] : memref<1x8x8xf32, #tpu.memory_space<vmem>>, vector<1x8x8xf32>
        %32 = vector.shape_cast %31 : vector<1x8x8xf32> to vector<8x8xf32>
        %33 = vector.shape_cast %20 : vector<8x8xf32> to vector<1x8x8xf32>
        tpu.vector_store %arg8[%c0_17, %c0_18, %c0_19], %33 {strides = array<i32>} : memref<1x8x8xf32, #tpu.memory_space<vmem>>, vector<1x8x8xf32>,
      } else {
      }
      %true = arith.constant true
      %28 = arith.xori %25, %true : i1
      %29 = arith.extui %28 : i1 to i32
      %c0_i32_16 = arith.constant 0 : i32
      %30 = arith.cmpi ne, %29, %c0_i32_16 : i32
      scf.if %30 {
        %31 = tpu.iota {dimensions = array<i32: 0>} : vector<8x1xi32>
        %32 = vector.broadcast %18 : i32 to vector<8x1xi32>
        %33 = arith.addi %32, %31 : vector<8x1xi32>
        %34 = vector.broadcast %15 : i32 to vector<8x1xi32>
        %35 = arith.cmpi slt, %33, %34 : vector<8x1xi32>
        %36 = tpu.iota {dimensions = array<i32: 1>} : vector<1x8xi32>
        %37 = vector.broadcast %19 : i32 to vector<1x8xi32>
        %38 = arith.addi %37, %36 : vector<1x8xi32>
        %39 = vector.broadcast %17 : i32 to vector<1x8xi32>
        %40 = arith.cmpi slt, %38, %39 : vector<1x8xi32>
        %41 = vector.broadcast %35 : vector<8x1xi1> to vector<8x8xi1>
        %42 = vector.broadcast %40 : vector<1x8xi1> to vector<8x8xi1>
        %43 = arith.andi %41, %42 : vector<8x8xi1>
        %cst_17 = arith.constant -1.000000e+10 : f32
        %44 = vector.broadcast %cst_17 : f32 to vector<8x8xf32>
        %45 = arith.select %43, %20, %44 : vector<8x8xi1>, vector<8x8xf32>
        %c0_18 = arith.constant 0 : index
        %c0_19 = arith.constant 0 : index
        %c0_20 = arith.constant 0 : index
        %46 = vector.load %arg8[%c0_18, %c0_19, %c0_20] : memref<1x8x8xf32, #tpu.memory_space<vmem>>, vector<1x8x8xf32>
        %47 = vector.shape_cast %46 : vector<1x8x8xf32> to vector<8x8xf32>
        %48 = vector.shape_cast %45 : vector<8x8xf32> to vector<1x8x8xf32>
        tpu.vector_store %arg8[%c0_18, %c0_19, %c0_20], %48 {strides = array<i32>} : memref<1x8x8xf32, #tpu.memory_space<vmem>>, vector<1x8x8xf32>,
      } else {
      }
    } else {
    }
    return
  }
  func.func @transform_0(%arg0: i32, %arg1: i32, %arg2: i32, %arg3: i32, %arg4: memref<2xi32, #tpu.memory_space<smem>>, %arg5: memref<2xi32, #tpu.memory_space<smem>>) -> (i32, i32, i32) {
    %c0_i32 = arith.constant 0 : i32
    return %arg0, %arg1, %arg3 : i32, i32, i32
  }
  func.func @transform_1(%arg0: i32, %arg1: i32, %arg2: i32, %arg3: i32, %arg4: memref<2xi32, #tpu.memory_space<smem>>, %arg5: memref<2xi32, #tpu.memory_space<smem>>) -> (i32, i32, i32) {
    %c0_i32 = arith.constant 0 : i32
    return %arg0, %arg2, %arg3 : i32, i32, i32
  }
  func.func @transform_2(%arg0: i32, %arg1: i32, %arg2: i32, %arg3: i32, %arg4: memref<2xi32, #tpu.memory_space<smem>>, %arg5: memref<2xi32, #tpu.memory_space<smem>>) -> (i32, i32, i32) {
    %c0_i32 = arith.constant 0 : i32
    return %arg0, %arg1, %arg2 : i32, i32, i32
  }
}

</mosaic_0001>

<bundles_post_ra>
// kernel: tpu_custom_call.1
= control target key start
LH: loop header
LB: loop body
LE: loop exit
PB: predicated region body
PF: predicated region fallthrough
CT: control target
= control target key end

     0   :  { %s735_s21 = smov [#allocation4]   ;;  %s736_s22 = smov [#allocation5]   ;;  %s901_s0 = inlined_call_operand.hbm [shape: s32[2], index: 0, kind: input, shape index: {}]   ;;  %s902_s2 = inlined_call_operand.hbm [shape: f32[2,8,32], index: 2, kind: input, shape index: {}]   ;;  %s903_s3 = inlined_call_operand.hbm [shape: f32[2,8,32], index: 3, kind: input, shape index: {}]   ;;  %s904_s4 = inlined_call_operand.hbm [shape: f32[2,8,8], index: 4, kind: output, shape index: {}]   ;;  %s905_s1 = inlined_call_operand.hbm [shape: s32[2], index: 1, kind: input, shape index: {}]  }
   0x1   :  { %s10_s17 = sshll.u32 %s901_s0, 4  ;;  %s15_s20 = sshll.u32 %s905_s1, 4  ;;  %s11_s17 = int_to_ptr.hbm [resolvable:$true] %s10_s17  ;;  %s16_s20 = int_to_ptr.hbm [resolvable:$true] %s15_s20 }
   0x2   :  { %13 = dma.hbm_to_smem %s11_s17, 16, %s735_s21, [#allocation3] }
   0x3   :  { %18 = dma.hbm_to_smem %s16_s20, 16, %s736_s22, [#allocation3] }
   0x4   :  { %697 = dma.done.wait [#allocation3], 32 }
   0x5   :  { %698 = vsyncadd [#allocation3], 4294967264 }
   0x6   :  { %21 = sfence }
   0x7   :  { %22 = vsyncpa [#allocation7], 0 }
   0x8   :  { %24 = vsyncpa [#allocation7 + $0x1], 0 }
   0x9   :  { %25 = vsyncpa [#allocation10], 0 }
   0xa   :  { %27 = vsyncpa [#allocation10 + $0x1], 0 }
   0xb   :  { %28 = vsyncpa [#allocation8], 0 }
   0xc   :  { %30 = vsyncpa [#allocation8 + $0x1], 0  ;;  %s768_s0 = smov 0   ;;  %s770_s23 = smov 0  }
   0xd   :  { %s772_s1 = smov 0   ;;  %s774_s24 = smov 0  }
   0xe   :  { %s776_s25 = smov 0   ;;  %s778_s26 = smov 0  }
   0xf LB: > { %s472_s27 = sadd.s32 4294967295, %s733_s26   ;;  %s473_s28 = sadd.s32 4294967294, %s733_s26   ;;  %s733_s26 = sphi %s778_s26, %s36_s26   ;;  %s729_s25 = sphi %s776_s25, %s914_s25   ;;  %s725_s24 = sphi %s774_s24, %s913_s24   ;;  %s721_s1 = sphi %s772_s1, %s912_s1   ;;  %s717_s23 = sphi %s770_s23, %s911_s23   ;;  %s713_s0 = sphi %s768_s0, %s910_s0  }
  0x10   : > { %s62_s29 = sadd.s32 1, %s729_s25  ;;  %s73_s30 = sadd.s32 1, %s721_s1 }
  0x11   : > { %p64_p0 = scmp.ge.s32.totalorder %s62_s29, 2  ;;  %p80_p1 = scmp.ne.s32.totalorder %s721_s1, %s717_s23 }
  0x12   : > { %p81_p2 = scmp.eq.s32.totalorder %s733_s26, 0  ;;  %p86_p3 = scmp.ne.s32.totalorder %s717_s23, %s713_s0 }
  0x13   : > { %s916_s29 = smov (%p64_p0, %s62_s29), 0  ;;  %p87_p5 = scmp.eq.s32.totalorder %s472_s27, 0 }
  0x14   : > { %p809_p4 = por %p81_p2, %p80_p1  ;;  %s66_s6 = ssub.s32 %s729_s25, %s916_s29 }
  0x15   : > { %p144_p6 = scmp.eq.s32.totalorder %s472_s27, 1  ;;  %p71_p7 = scmp.eq.s32.totalorder %s66_s6, 0 }
  0x16   : > { %p815_p8 = por %p87_p5, %p86_p3  ;;  %p150_p10 = scmp.eq.s32.totalorder %s473_s28, 1 }
  0x17   : > { %p819_p9 = por %p144_p6, %p80_p1  ;;  %p475_p12 = scmp.ge.s32.totalorder %s733_s26, 2 }
  0x18   : > { %s824_s9 = scalar_select %p71_p7, %s721_s1, %s73_s30  }
  0x19   : > { %p826_p11 = por %p150_p10, %p86_p3  ;;  %p509_p13 = scmp.lt.s32.totalorder %s733_s26, 2 }
  0x1a   : > { %s170_s11 = sand.u32 1, %s721_s1   ;;  %s477_s13 = sshll.u32 %s729_s25, 3 }
  0x1b   : > { %s476_s12 = sshll.u32 %s170_s11, 3  ;;  %s180_s16 = scalar_lea.hbm %s902_s2, %s477_s13 }
  0x1c   : > { %s174_s17 = scalar_lea.vmem [#allocation6], %s476_s12  ;;  %s182_s19 = sshll.u32 %s180_s16, 4  ;;  %s183_s19 = int_to_ptr.hbm [resolvable:$true] %s182_s19 }
  0x1d   : > { %s184_s18 = sshll.u32 %s174_s17, 4  ;;  %p499_p0 = pnand %p509_p13, %p809_p4  ;;  %s185_s18 = int_to_ptr.vmem [resolvable:$true] %s184_s18 }
  0x1e   : > { %p480_p1 = scmp.ge.s32.totalorder %s733_s26, 1  ;;  %p210_p2 = scmp.lt.s32.totalorder %s733_s26, 3 }
  0x1f   : > { %s171_s20 = scalar_lea.sflag [#allocation7], %s170_s11  ;;  %s201_s27 = scalar_lea.hbm %s903_s3, %s477_s13 }
  0x20   : > { %501 = dma.hbm_to_vmem [thread:$0]  (!%p499_p0), %s183_s19, 128, %s185_s18, %s171_s20  }
  0x21   : > { %p211_p3 = pnand %p480_p1, %p210_p2  ;;  %s195_s28 = scalar_lea.vmem [#allocation9], %s476_s12 }
  0x22   : > { %s205_s30 = sshll.u32 %s195_s28, 4  ;;  %s203_s6 = sshll.u32 %s201_s27, 4  ;;  %s206_s30 = int_to_ptr.vmem [resolvable:$true] %s205_s30  ;;  %s204_s6 = int_to_ptr.hbm [resolvable:$true] %s203_s6 }
  0x23   : > { %s192_s14 = scalar_lea.sflag [#allocation10], %s170_s11  ;;  %214 = sbr.rel (%p211_p3) target bundleno = 205 (0xcd), region = 28 }
  0x24   : > { %504 = dma.hbm_to_vmem [thread:$0]  (!%p499_p0), %s204_s6, 128, %s206_s30, %s192_s14  }
  0x25   : > { %s845_s5 = sand.u32 (!%p211_p3), 1, %s717_s23  }
  0x26   : > { %s481_s15 = sshll.u32 (!%p211_p3), %s845_s5, 3  ;;  %s217_s16 = scalar_lea.sflag (!%p211_p3), [#allocation7], %s845_s5 }
  0x27   : > { %s220_s17 = scalar_lea.vmem (!%p211_p3), [#allocation6], %s481_s15 }
  0x28   : > { %700 = dma.done.wait (%p815_p8), %s217_s16, 128  }
  0x29   : > { %702 = vsyncadd (%p815_p8), %s217_s16, 4294967168  ;;  %s227_s12 = scalar_lea.sflag [#allocation10], %s845_s5  ;;  %s230_s11 = scalar_lea.vmem [#allocation9], %s481_s15 }
  0x2a   : > { %704 = dma.done.wait (%p815_p8), %s227_s12, 128  }
  0x2b   : > { %706 = vsyncadd (%p815_p8), %s227_s12, 4294967168  ;;  %s303_s13 = sld [smem:[#allocation4 + %s725_s24]]  ;;  %vm259_vm0 = vcmask 261120   ;;  %v258_v0 = vld [vmem:[%s230_s11] sm:$0xff]  ;;  %v257_v1 = vld [vmem:[%s220_s17] sm:$0xff]  ;;  %vm290_vm1 = vcmask 64512  }
  0x2c   : > { %s304_s18 = sld [smem:[#allocation5 + %s725_s24]]  ;;  %484 = vmatpush.xpose.msk.msra.mxu0 %vm259_vm0, %v258_v0  ;;  %s256_s19 = scalar_lea.vmem [#allocation11], %s481_s15 }
  0x2f   : > { %485 = vmatmul.msk.f32.vlgmr.msra.gmra.mxu0 %vm259_vm0, %v257_v1 }
  0x31   : > { %p486_p4 = scmp.ge.s32.totalorder %s303_s13, 8 }
  0x32   : > { %p487_p5 = scmp.ge.s32.totalorder %s304_s18, 8 }
  0x34   : > { %p312_p6 = pnand %p487_p5, %p486_p4 }
  0xac   : > { %v283_v2 = vpop.f32.mrf.mxu0 }
  0xad   : > { %291 = vst.msk [vmem:[#allocation2] sm:$0xff] %vm290_vm1, %v283_v2 }
  0xb0   : > { %315 = sbr.rel (%p312_p6) target bundleno = 182 (0xb6), region = 52 }
  0xb4   : > { %v307_v3 = vld [vmem:[#allocation2] sm:$0xff] }
  0xb5   : > { %317 = vst.msk [vmem:[%s256_s19] sm:$0xff] %vm290_vm1, %v307_v3 }
  0xb6 PF: > { %320 = sbr.rel (!%p312_p6) target bundleno = 190 (0xbe), region = 56  ;;  %v321_v4 = vlaneseq (%p312_p6)  ;;  %v325_v5 = vstv (%p312_p6), %s303_s13  ;;  %v331_v6 = vstv (%p312_p6), %s304_s18 }
  0xb8   : > { %v322_v7 = vshrl.u32 (%p312_p6), %v321_v4, 7  ;;  %v328_v8 = vand.u32 (%p312_p6), 127, %v321_v4 }
  0xba   : > { %vm326_vm2 = vcmp.lt.s32.totalorder (%p312_p6), %v322_v7, %v325_v5  ;;  %vm332_vm3 = vcmp.lt.s32.totalorder (%p312_p6), %v328_v8, %v331_v6 }
  0xbb   : > { %vm337_vm4 = vmand %vm326_vm2, %vm332_vm3 }
  0xbc   : > { %v338_v9 = vsel %vm337_vm4, %v307_v3, -1e+10 }
  0xbd   : > { %340 = vst.msk [vmem:[%s256_s19] sm:$0xff] %vm290_vm1, %v338_v9 }
  0xbe PF: > { %s489_s7 = sshll.u32 %s725_s24, 3  ;;  %s356_s27 = sshll.u32 %s256_s19, 4  ;;  %s357_s27 = int_to_ptr.vmem [resolvable:$true] %s356_s27 }
  0xbf   : > { %s354_s22 = scalar_lea.hbm %s904_s4, %s489_s7  ;;  %s342_s30 = scalar_lea.sflag [#allocation8], %s845_s5 }
  0xc0   : > { %s358_s28 = sshll.u32 %s354_s22, 4  ;;  %s665_s24 = scalar_lea.hbm %s904_s4, 16  ;;  %s359_s28 = int_to_ptr.hbm [resolvable:$true] %s358_s28 }
  0xc1   : > { %s659_s6 = sshra.s32 %s359_s28, 4  ;;  %s660_s6 = int_to_ptr.hbm [resolvable:$true] %s659_s6 }
  0xc2   : > { %s661_s14 = scalar_lea.hbm %s660_s6, 8  ;;  %p666_p13 = scmp.lt.s32.totalorder %s660_s6, %s904_s4 }
  0xc3   : > { %p662_p7 = scmp.ne.s32.totalorder %s660_s6, %s661_s14  ;;  %p667_p0 = scmp.lt.s32.totalorder %s665_s24, %s661_s14 }
  0xc5   : > { %p663_p8 = pnand %p662_p7, %p819_p9  ;;  %p668_p1 = por %p667_p0, %p666_p13 }
  0xc7   : > { %p664_p10 = pneg %p663_p8 }
  0xc9   : > { %p669_p2 = pnand %p668_p1, %p664_p10 }
  0xcb   : > { %672 = shalt.err (!%p669_p2)
}
  0xcc   : > { %496 = dma.vmem_to_hbm [thread:$0]  (%p819_p9), %s357_s27, 128, %s359_s28, %s342_s30  }
  0xcd PF: > { %s370_s5 = sand.u32 1, %s713_s0   ;;  %p506_p3 = pnand %p475_p12, %p826_p11 }
  0xce   : > { %s371_s11 = scalar_lea.sflag [#allocation8], %s370_s5 }
  0xcf   : > { %p507_p4 = pneg %p506_p3 }
  0xd1   : > { %708 = dma.done.wait (%p507_p4), %s371_s11, 128  }
  0xd2   : > { %710 = vsyncadd (%p507_p4), %s371_s11, 4294967168  ;;  %s36_s26 = sadd.s32 1, %s733_s26   ;;  %s910_s0 = smov %s717_s23 }
  0xd3   : > { %p33_p5 = scmp.ge.s32.totalorder %s36_s26, 4   ;;  %s911_s23 = smov %s721_s1 }
  0xd4   : > { %s912_s1 = smov %s824_s9  ;;  %s913_s24 = smov %s729_s25 }
  0xd5   : > { %s914_s25 = smov %s916_s29  ;;  %35 = sbr.rel (!%p33_p5) target bundleno = 15 (0xf), region = 106 }
  0xda   :  { %377 = vsyncpa [#allocation7], 1 }
  0xdb   :  { %379 = vsyncpa [#allocation7 + $0x1], 1 }
  0xdc   :  { %380 = vsyncpa [#allocation10], 1 }
  0xdd   :  { %382 = vsyncpa [#allocation10 + $0x1], 1 }
  0xde   :  { %383 = vsyncpa [#allocation8], 1 }
  0xdf   :  { %385 = vsyncpa [#allocation8 + $0x1], 1 }

</bundles_post_ra>
